<compile_context>
chip_gen: v6e
topology: v6e:2x2x1
jax: 0.10.0
libtpu: 0.0.40
codegen_flags: <defaults>
</compile_context>

<pallas_src>
import functools

import jax
import jax.numpy as jnp
from jax import lax
from jax.experimental import pallas as pl
from jax.experimental.pallas import tpu as pltpu

HIDDEN = 128                     # hidden width fixed by the module (Linear(input, 128))
_MAX_BLOCK_B = 4096              # upper bound on batch rows per grid step
_FALLBACK_VMEM_CAP = 64 << 20    # conservative physical VMEM (v7x) if query fails


def _round_up(n, m):
    return ((n + m - 1) // m) * m


def _vmem_capacity_bytes():
    """Per-generation physical VMEM (v5e/v6e: 128 MiB, v7x: 64 MiB)."""
    try:
        cap = int(getattr(pltpu.get_tpu_info(), "vmem_capacity_bytes", 0))
        if cap > 0:
            return cap
    except Exception:
        pass
    return _FALLBACK_VMEM_CAP


# ----------------------------------------------------------------------------
# Kernel
# ----------------------------------------------------------------------------
def _disc_kernel(x_ref, w1_ref, b1_ref, w2t_ref, b2_ref, o_ref, *,
                 lane_dense, mxu_bf16):
    x = x_ref[...]
    w1 = w1_ref[...]
    # ---- Linear 1 on the MXU: (TB, D) @ (D, 128) + (1, 128) ----
    if mxu_bf16:
        # Single-pass bf16 MXU (matters on v5e); f32 accumulate.
        h = jnp.dot(x.astype(jnp.bfloat16), w1.astype(jnp.bfloat16),
                    preferred_element_type=jnp.float32)
    else:
        # Full f32 accuracy to match the f32 PyTorch reference; the extra MXU
        # passes are hidden behind the x DMA for realistic D.
        h = jnp.dot(x, w1, preferred_element_type=jnp.float32,
                    precision=lax.Precision.HIGHEST)
    h = h + b1_ref[...]
    # ---- LeakyReLU(0.01): vmul + vmax ----
    h = jnp.maximum(h, 0.01 * h)
    # ---- Linear 2 (out_features == 1) as VPU multiply + lane reduction ----
    # w2 stored as a (1, 128) row: no degenerate (128, 1) MXU matmul.
    y = jnp.sum(h * w2t_ref[...], axis=-1, keepdims=True)      # (TB, 1)
    y = y + b2_ref[0, 0]                                        # scalar bias (SMEM)
    # ---- Sigmoid via a single EUP op: sigmoid(y) = 0.5 * (tanh(y/2) + 1) ----
    s = 0.5 * (jnp.tanh(0.5 * y) + 1.0)
    # NOTE: on the ragged last block, rows beyond B hold unspecified data; this
    # is safe because rows are independent and OOB output writes are clipped.
    if lane_dense:
        # (TB, 1) -> (1, TB): lane-dense store (unmasked vst, dense writeback).
        o_ref[...] = s.reshape(o_ref.shape).astype(o_ref.dtype)
    else:
        o_ref[...] = s.astype(o_ref.dtype)


# ----------------------------------------------------------------------------
# pallas_call builder
# ----------------------------------------------------------------------------
def _x_block_spec(tb, d, n_buf):
    idx = lambda i: (i, 0)
    if n_buf > 2 and hasattr(pl, "Buffered"):
        try:
            return pl.BlockSpec((tb, d), idx, pipeline_mode=pl.Buffered(n_buf))
        except TypeError:   # older BlockSpec signature without pipeline_mode
            pass
    return pl.BlockSpec((tb, d), idx)


def _build_pallas_call(b_pad, d, tb, *, n_buf, lane_dense, mxu_bf16,
                       vmem_limit_bytes):
    grid = (pl.cdiv(b_pad, tb),)
    in_specs = [
        _x_block_spec(tb, d, n_buf),                          # x: batch-tiled
        pl.BlockSpec((d, HIDDEN), lambda i: (0, 0)),          # W1: resident
        pl.BlockSpec((1, HIDDEN), lambda i: (0, 0)),          # b1: resident
        pl.BlockSpec((1, HIDDEN), lambda i: (0, 0)),          # w2^T row: resident
        pl.BlockSpec(memory_space=pltpu.MemorySpace.SMEM),    # b2: scalar in SMEM
    ]
    if lane_dense:
        out_shape = jax.ShapeDtypeStruct((1, b_pad), jnp.float32)
        out_specs = pl.BlockSpec((1, tb), lambda i: (0, i))
    else:
        out_shape = jax.ShapeDtypeStruct((b_pad, 1), jnp.float32)
        out_specs = pl.BlockSpec((tb, 1), lambda i: (i, 0))
    cost = pl.CostEstimate(
        flops=2 * b_pad * d * HIDDEN + 3 * b_pad * HIDDEN,
        transcendentals=b_pad,
        bytes_accessed=(b_pad * d * 4 + d * HIDDEN * 4 + 2 * HIDDEN * 4 + 4
                        + b_pad * 4),
    )
    return pl.pallas_call(
        functools.partial(_disc_kernel, lane_dense=lane_dense, mxu_bf16=mxu_bf16),
        out_shape=out_shape,
        grid_spec=pltpu.PrefetchScalarGridSpec(
            num_scalar_prefetch=0,
            grid=grid,
            in_specs=in_specs,
            out_specs=out_specs,
        ),
        compiler_params=pltpu.CompilerParams(
            # Batch tiles are independent -> "parallel" (shards across the two
            # TensorCores on v7x; neutral on single-TC v5e/v6e).
            dimension_semantics=("parallel",),
            vmem_limit_bytes=int(vmem_limit_bytes),
        ),
        cost_estimate=cost,
    )


@functools.lru_cache(maxsize=None)
def _lane_dense_supported():
    """One-time probe: can this Mosaic build relayout (TB, 1) -> (1, TB)?"""
    b = tb = d = 128
    call = _build_pallas_call(b, d, tb, n_buf=2, lane_dense=True,
                              mxu_bf16=False, vmem_limit_bytes=32 << 20)
    args = (
        jax.ShapeDtypeStruct((b, d), jnp.float32),
        jax.ShapeDtypeStruct((d, HIDDEN), jnp.float32),
        jax.ShapeDtypeStruct((1, HIDDEN), jnp.float32),
        jax.ShapeDtypeStruct((1, HIDDEN), jnp.float32),
        jax.ShapeDtypeStruct((1, 1), jnp.float32),
    )
    try:
        jax.jit(call).lower(*args).compile()
        return True
    except Exception:
        return False


def _pick_tile(b_pad, d, vmem_cap):
    """Batch tile TB (rows / grid step) and x pipeline depth."""
    if b_pad <= 128:
        # Single full-array block (no ragged blocks, no extra padding).
        return b_pad, 2
    # Budget ~1/4 of physical VMEM for the (up to triple-) buffered x tiles;
    # the rest covers resident W1, output blocks and compiler scratch.
    budget = vmem_cap // 4
    tb_vmem = (budget // (3 * d * 4)) // 128 * 128
    # Keep >= 2 grid steps so the "parallel" axis can use both TCs on v7x.
    tb_half = _round_up(pl.cdiv(b_pad, 2), 128)
    tb = max(128, min(tb_vmem, _MAX_BLOCK_B, tb_half))
    # Triple-buffer x when the per-step tile is small (overhead-bound regime).
    n_buf = 3 if tb * d * 4 <= (2 << 20) else 2
    return tb, n_buf


# ----------------------------------------------------------------------------
# Public wrapper
# ----------------------------------------------------------------------------
def discriminator_forward(x, w1, b1, w2, b2, *, lane_dense=None, mxu_bf16=False):
    """x: (B, D) f32; w1: (D, 128); b1: (1, 128); w2: (128, 1); b2: (1, 1).

    Returns sigmoid(leaky_relu(x @ w1 + b1, 0.01) @ w2 + b2), shape (B, 1).
    """
    B, D = x.shape
    assert w1.shape == (D, HIDDEN)
    assert b1.shape == (1, HIDDEN)
    assert w2.shape == (HIDDEN, 1)
    assert b2.shape == (1, 1)

    if lane_dense is None:
        lane_dense = _lane_dense_supported()    # cached, one compile per process

    # Pad the batch to a multiple of 8 at most (sublane granularity); ragged
    # last grid blocks handle the rest -- no full-tile jnp.pad copy of x.
    b_pad = _round_up(B, 8)
    x_p = x if b_pad == B else jnp.pad(x, ((0, b_pad - B), (0, 0)))
    w2t = w2.reshape(1, HIDDEN)            # second-layer weights as a (1, 128) row

    vmem_cap = _vmem_capacity_bytes()
    tb, n_buf = _pick_tile(b_pad, D, vmem_cap)

    # Explicit VMEM limit sized from the actual buffers (v5e's 16 MiB default
    # scoped limit is too small for large D; v7x has only 64 MiB physical).
    needed = (n_buf * tb * D * 4            # x tiles
              + 2 * D * HIDDEN * 4          # W1 (double-buffered worst case)
              + 4 * HIDDEN * 4              # b1 + w2 row
              + 2 * tb * 128 * 4            # output blocks (lane-padded worst case)
              + (2 << 20))                  # compiler scratch headroom
    vmem_limit = min(max(needed, 16 << 20), vmem_cap)

    call = _build_pallas_call(b_pad, D, tb, n_buf=n_buf, lane_dense=lane_dense,
                              mxu_bf16=mxu_bf16, vmem_limit_bytes=vmem_limit)
    out = call(x_p, w1, b1, w2t, b2)
    if lane_dense:
        return out[0, :B].reshape(B, 1)
    return out[:B]


def reference_forward(x, w1, b1, w2, b2):
    h = x @ w1 + b1
    h = jnp.where(h > 0, h, 0.01 * h)
    y = h @ w2 + b2
    return 1.0 / (1.0 + jnp.exp(-y))


if __name__ == "__main__":
    key = jax.random.PRNGKey(0)
    k_x, k_w1, k_b1, k_w2, k_b2 = jax.random.split(key, 5)

    B = 8     # batch
    D = 64    # input feature dim (the `input` arg of Discriminator.__init__)

    x = jax.random.normal(k_x, (B, D), dtype=jnp.float32)
    w1 = jax.random.normal(k_w1, (D, HIDDEN), dtype=jnp.float32) * 0.05
    b1 = jax.random.normal(k_b1, (1, HIDDEN), dtype=jnp.float32) * 0.05
    w2 = jax.random.normal(k_w2, (HIDDEN, 1), dtype=jnp.float32) * 0.05
    b2 = jax.random.normal(k_b2, (1, 1), dtype=jnp.float32) * 0.05

    out = jax.block_until_ready(discriminator_forward(x, w1, b1, w2, b2))
    ref = reference_forward(x, w1, b1, w2, b2)

    assert out.shape == (B, 1), out.shape
    assert jnp.allclose(out, ref, atol=1e-5, rtol=1e-5), "mismatch vs reference"
    print("KERNEL_OK")
</pallas_src>

<mosaic_0001>
module attributes {stable_mosaic.version = 11 : i64} {
  func.func @_disc_kernel(%arg0: i32, %arg1: memref<8x64xf32, #tpu.memory_space<vmem>>, %arg2: memref<64x128xf32, #tpu.memory_space<vmem>>, %arg3: memref<1x128xf32, #tpu.memory_space<vmem>>, %arg4: memref<1x128xf32, #tpu.memory_space<vmem>>, %arg5: memref<1x1xf32, #tpu.memory_space<smem>>, %arg6: memref<8x1xf32, #tpu.memory_space<vmem>>) attributes {dimension_semantics = [#tpu.dimension_semantics<parallel>], iteration_bounds = array<i64: 1>, scalar_prefetch = 0 : i64, scratch_operands = 0 : i64, tpu.core_type = #tpu.core_type<tc>, window_params = [{transform_indices = @transform_0, window_bounds = array<i64: 8, 64>}, {pipeline_mode = #tpu.pipeline_mode<synchronous>, transform_indices = @transform_1, window_bounds = array<i64: 64, 128>}, {pipeline_mode = #tpu.pipeline_mode<synchronous>, transform_indices = @transform_2, window_bounds = array<i64: 1, 128>}, {pipeline_mode = #tpu.pipeline_mode<synchronous>, transform_indices = @transform_3, window_bounds = array<i64: 1, 128>}, {transform_indices = @transform_4, window_bounds = array<i64: 1, 1>}, {transform_indices = @transform_5, window_bounds = array<i64: 8, 1>}]} {
    %c0 = arith.constant 0 : index
    %c0_0 = arith.constant 0 : index
    %0 = vector.load %arg1[%c0, %c0_0] : memref<8x64xf32, #tpu.memory_space<vmem>>, vector<8x64xf32>
    %c0_1 = arith.constant 0 : index
    %c0_2 = arith.constant 0 : index
    %1 = vector.load %arg2[%c0_1, %c0_2] : memref<64x128xf32, #tpu.memory_space<vmem>>, vector<64x128xf32>
    %cst = arith.constant dense<0.000000e+00> : vector<8x128xf32>
    %2 = tpu.matmul %0, %1, %cst {dimension_numbers = #tpu.dot_dimension_numbers<[1], [0], [0], [1], [0, 0, 1, 1], [], []>, precision = #tpu.contract_precision<fp32>} : vector<8x64xf32>, vector<64x128xf32>, vector<8x128xf32> -> vector<8x128xf32>
    %c0_3 = arith.constant 0 : index
    %c0_4 = arith.constant 0 : index
    %3 = vector.load %arg3[%c0_3, %c0_4] : memref<1x128xf32, #tpu.memory_space<vmem>>, vector<1x128xf32>
    %4 = vector.broadcast %3 : vector<1x128xf32> to vector<8x128xf32>
    %5 = arith.addf %2, %4 : vector<8x128xf32>
    %cst_5 = arith.constant 0.00999999977 : f32
    %6 = vector.broadcast %cst_5 : f32 to vector<8x128xf32>
    %7 = arith.mulf %6, %5 : vector<8x128xf32>
    %8 = arith.maximumf %5, %7 : vector<8x128xf32>
    %c0_6 = arith.constant 0 : index
    %c0_7 = arith.constant 0 : index
    %9 = vector.load %arg4[%c0_6, %c0_7] : memref<1x128xf32, #tpu.memory_space<vmem>>, vector<1x128xf32>
    %10 = vector.broadcast %9 : vector<1x128xf32> to vector<8x128xf32>
    %11 = arith.mulf %8, %10 : vector<8x128xf32>
    %cst_8 = arith.constant dense<0.000000e+00> : vector<8xf32>
    %12 = vector.multi_reduction <add>, %11, %cst_8 [1] : vector<8x128xf32> to vector<8xf32>
    %13 = vector.shape_cast %12 : vector<8xf32> to vector<8x1xf32>
    %c0_9 = arith.constant 0 : index
    %c0_10 = arith.constant 0 : index
    %14 = memref.load %arg5[%c0_9, %c0_10] : memref<1x1xf32, #tpu.memory_space<smem>>
    %15 = vector.broadcast %14 : f32 to vector<8x1xf32>
    %16 = arith.addf %13, %15 : vector<8x1xf32>
    %cst_11 = arith.constant 5.000000e-01 : f32
    %17 = vector.broadcast %cst_11 : f32 to vector<8x1xf32>
    %18 = arith.mulf %17, %16 : vector<8x1xf32>
    %19 = math.tanh %18 : vector<8x1xf32>
    %cst_12 = arith.constant 1.000000e+00 : f32
    %20 = vector.broadcast %cst_12 : f32 to vector<8x1xf32>
    %21 = arith.addf %19, %20 : vector<8x1xf32>
    %cst_13 = arith.constant 5.000000e-01 : f32
    %22 = vector.broadcast %cst_13 : f32 to vector<8x1xf32>
    %23 = arith.mulf %22, %21 : vector<8x1xf32>
    %c0_14 = arith.constant 0 : index
    %c0_15 = arith.constant 0 : index
    %24 = vector.load %arg6[%c0_14, %c0_15] : memref<8x1xf32, #tpu.memory_space<vmem>>, vector<8x1xf32>
    tpu.vector_store %arg6[%c0_14, %c0_15], %23 {strides = array<i32>} : memref<8x1xf32, #tpu.memory_space<vmem>>, vector<8x1xf32>,
    return
  }
  func.func @transform_0(%arg0: i32) -> (i32, i32) {
    %c0_i32 = arith.constant 0 : i32
    %c0_i32_0 = arith.constant 0 : i32
    return %arg0, %c0_i32 : i32, i32
  }
  func.func @transform_1(%arg0: i32) -> (i32, i32) {
    %c0_i32 = arith.constant 0 : i32
    %c0_i32_0 = arith.constant 0 : i32
    %c0_i32_1 = arith.constant 0 : i32
    return %c0_i32, %c0_i32_0 : i32, i32
  }
  func.func @transform_2(%arg0: i32) -> (i32, i32) {
    %c0_i32 = arith.constant 0 : i32
    %c0_i32_0 = arith.constant 0 : i32
    %c0_i32_1 = arith.constant 0 : i32
    return %c0_i32, %c0_i32_0 : i32, i32
  }
  func.func @transform_3(%arg0: i32) -> (i32, i32) {
    %c0_i32 = arith.constant 0 : i32
    %c0_i32_0 = arith.constant 0 : i32
    %c0_i32_1 = arith.constant 0 : i32
    return %c0_i32, %c0_i32_0 : i32, i32
  }
  func.func @transform_4(%arg0: i32) -> (i32, i32) {
    %c0_i32 = arith.constant 0 : i32
    %c0_i32_0 = arith.constant 0 : i32
    %c0_i32_1 = arith.constant 0 : i32
    return %c0_i32, %c0_i32_0 : i32, i32
  }
  func.func @transform_5(%arg0: i32) -> (i32, i32) {
    %c0_i32 = arith.constant 0 : i32
    %c0_i32_0 = arith.constant 0 : i32
    return %arg0, %c0_i32 : i32, i32
  }
}

</mosaic_0001>

<bundles_post_ra>
// kernel: tpu_custom_call.1
= control target key start
LH: loop header
LB: loop body
LE: loop exit
PB: predicated region body
PF: predicated region fallthrough
CT: control target
= control target key end

     0   :  { %11 = vsyncpa [#allocation4], 0  ;;  %s1103_s0 = inlined_call_operand.hbm [shape: f32[8,64], index: 0, kind: input, shape index: {}]   ;;  %s1104_s1 = inlined_call_operand.hbm [shape: f32[64,128], index: 1, kind: input, shape index: {}]   ;;  %s1105_s2 = inlined_call_operand.vmem [shape: f32[1,128], index: 2, kind: input, shape index: {}]   ;;  %s1106_s3 = inlined_call_operand.vmem [shape: f32[1,128], index: 3, kind: input, shape index: {}]   ;;  %s1107_s4 = inlined_call_operand.<no memory space> [shape: f32[1,1], index: 4, kind: input, shape index: {}]   ;;  %s1108_s5 = inlined_call_operand.vmem [shape: f32[8,1], index: 5, kind: output, shape index: {}]  }
   0x1   :  { %12 = vsyncpa [#allocation6], 0  ;;  %s853_s18 = smov [#allocation3]   ;;  %s854_s20 = smov [#allocation5]  }
   0x2   :  { %s19_s19 = sshll.u32 %s853_s18, 4  ;;  %s28_s21 = sshll.u32 %s854_s20, 4  ;;  %s20_s19 = int_to_ptr.vmem [resolvable:$true] %s19_s19  ;;  %s29_s21 = int_to_ptr.vmem [resolvable:$true] %s28_s21 }
   0x3   :  { %s817_s22 = scalar_lea.vmem %s20_s19, 128  ;;  %p822_p1 = scmp.lt.s32.totalorder %s20_s19, %s20_s19 }
   0x4   :  { %p818_p0 = scmp.ne.s32.totalorder %s20_s19, %s817_s22  ;;  %p823_p2 = scmp.lt.s32.totalorder %s817_s22, %s817_s22 }
   0x6   :  { %p824_p3 = por %p823_p2, %p822_p1 }
   0x8   :  { %p825_p4 = pnand %p824_p3, %p818_p0 }
   0xa   :  { %828 = shalt.err (!%p825_p4)
}
   0xb   :  { %22 = dma.hbm_to_vmem [thread:$0]  %s1103_s0, 128, %s20_s19, [#allocation4]  }
   0xc   :  { %s837_s25 = scalar_lea.vmem %s29_s21, 1024  ;;  %p842_p6 = scmp.lt.s32.totalorder %s29_s21, %s29_s21 }
   0xd   :  { %p838_p5 = scmp.ne.s32.totalorder %s29_s21, %s837_s25  ;;  %p843_p7 = scmp.lt.s32.totalorder %s837_s25, %s837_s25 }
   0xf   :  { %p844_p8 = por %p843_p7, %p842_p6 }
  0x11   :  { %p845_p9 = pnand %p844_p8, %p838_p5 }
  0x13   :  { %848 = shalt.err (!%p845_p9)
}
  0x14   :  { %s855_s26 = smov 128   ;;  %s856_s27 = smov 8  }
  0x15   :  { %34 = dma.hbm_to_vmem [thread:$0]  %s1104_s1, 1024, %s29_s21, [#allocation6], %s855_s26, %s855_s26, %s856_s27  }
  0x16   :  { %849 = dma.done.wait [#allocation4], 128  }
  0x17   :  { %850 = vsyncadd [#allocation4], 4294967168 }
  0x18   :  { %851 = dma.done.wait [#allocation6], 1024  }
  0x19   :  { %852 = vsyncadd [#allocation6], 4294966272  ;;  %v857_v0 = vmov 0.0   ;;  %vm858_vm0 = vmmov 0   ;;  %v55_v1 = vld [vmem:[#allocation5 + $0x38] sm:$0xff]  ;;  %v54_v2 = vld [vmem:[#allocation5 + $0x30] sm:$0xff] }
  0x1a   :  { %687 = vmatprep.subr.mxu0 %v857_v0  ;;  %706 = vmatprep.subr.mxu1 %v857_v0  ;;  %v53_v3 = vld [vmem:[#allocation5 + $0x28] sm:$0xff]  ;;  %vm63_vm1 = vcmask 523264   ;;  %v901_v4 = vand.u32 4294901760, %v55_v1  ;;  %v903_v5 = vand.u32 4294901760, %v54_v2  ;;  %v52_v7 = vld [vmem:[#allocation5 + $0x20] sm:$0xff]  ;;  %v51_v8 = vld [vmem:[#allocation5 + $0x18] sm:$0xff] }
  0x1b   :  { %703 = vmatprep.mubr.msk.f32.mxu0 %vm858_vm0, %v857_v0  ;;  %722 = vmatprep.mubr.msk.f32.mxu1 %vm858_vm0, %v857_v0  ;;  %v905_v6 = vand.u32 4294901760, %v53_v3  ;;  %v50_v9 = vld [vmem:[#allocation5 + $0x10] sm:$0xff]  ;;  %v907_v10 = vand.u32 4294901760, %v52_v7  ;;  %v909_v11 = vand.u32 4294901760, %v51_v8  ;;  %v49_v13 = vld [vmem:[#allocation5 + $0x8] sm:$0xff]  ;;  %v48_v14 = vld [vmem:[#allocation5] sm:$0xff] }
  0x1c   :  { %v911_v12 = vand.u32 4294901760, %v50_v9  ;;  %v47_v15 = vld [vmem:[#allocation3] sm:$0xff]  ;;  %688 = vmatpush3.msra.mxu0 %v901_v4  ;;  %v915_v16 = vsub.f32 %v55_v1, %v901_v4  ;;  %v918_v17 = vsub.f32 %v54_v2, %v903_v5  ;;  %v920_v18 = vand.u32 4294901760, %v49_v13 }
  0x1d   :  { %v923_v19 = vsub.f32 %v53_v3, %v905_v6  ;;  %689 = vmatprep.subr.mxu0 %v857_v0  ;;  %v926_v20 = vand.u32 4294901760, %v48_v14  ;;  %v929_v21 = vsub.f32 %v52_v7, %v907_v10  ;;  %v65_v22 = vsel %vm63_vm1, %v47_v15, 0  ;;  %v631_v1 = vld [vmem:[%s1105_s2] ss:$0 sm:$0xff] }
  0x1e   :  { %v933_v23 = vsub.f32 %v51_v8, %v909_v11  ;;  %690 = vmatpush3.msra.mxu0 %v903_v5  ;;  %v169_v24 = vand.u32 4294901760, %v915_v16  ;;  %v176_v25 = vand.u32 4294901760, %v918_v17  ;;  %v939_v27 = vand.u32 4294901760, %v65_v22 }
  0x1f   :  { %v183_v26 = vand.u32 4294901760, %v923_v19  ;;  %691 = vmatprep.subr.mxu0 %v857_v0  ;;  %v190_v28 = vand.u32 4294901760, %v929_v21  ;;  %v945_v30 = vsub.f32 %v50_v9, %v911_v12  ;;  %v948_v31 = vsub.f32 %v49_v13, %v920_v18 }
  0x20   :  { %v197_v29 = vand.u32 4294901760, %v933_v23  ;;  %692 = vmatpush3.msra.mxu0 %v905_v6  ;;  %v170_v32 = vsub.f32 %v915_v16, %v169_v24  ;;  %v177_v33 = vsub.f32 %v918_v17, %v176_v25  ;;  %v961_v35 = vsub.f32 %v65_v22, %v939_v27 }
  0x21   :  { %v184_v34 = vsub.f32 %v923_v19, %v183_v26  ;;  %693 = vmatprep.subr.mxu0 %v857_v0  ;;  %v191_v36 = vsub.f32 %v929_v21, %v190_v28  ;;  %v204_v40 = vand.u32 4294901760, %v945_v30  ;;  %v211_v44 = vand.u32 4294901760, %v948_v31 }
  0x22   :  { %694 = vmatpush3.msra.mxu0 %v907_v10  ;;  %v171_v37 = vand.u32 4294901760, %v170_v32  ;;  %v178_v38 = vand.u32 4294901760, %v177_v33  ;;  %v142_v39 = vand.u32 4294901760, %v961_v35  ;;  %v198_v41 = vsub.f32 %v933_v23, %v197_v29 }
  0x23   :  { %695 = vmatprep.subr.mxu0 %v857_v0  ;;  %v185_v42 = vand.u32 4294901760, %v184_v34  ;;  %v980_v45 = vsub.f32 %v48_v14, %v926_v20  ;;  %v192_v46 = vand.u32 4294901760, %v191_v36  ;;  %v205_v47 = vsub.f32 %v945_v30, %v204_v40 }
  0x24   :  { %696 = vmatpush3.msra.mxu0 %v909_v11  ;;  %707 = vmatpush3.msra.mxu1 %v171_v37  ;;  %v143_v43 = vsub.f32 %v961_v35, %v142_v39  ;;  %v199_v50 = vand.u32 4294901760, %v198_v41  ;;  %v212_v51 = vsub.f32 %v948_v31, %v211_v44  ;;  %v617_v15 = vstv %s1107_s4 }
  0x25   :  { %697 = vmatprep.subr.mxu0 %v857_v0  ;;  %708 = vmatprep.subr.mxu1 %v857_v0  ;;  %v218_v48 = vand.u32 4294901760, %v980_v45  ;;  %v206_v52 = vand.u32 4294901760, %v205_v47  ;;  %vm623_vm2 = vcmask 7168  }
  0x26   :  { %698 = vmatpush3.msra.mxu0 %v911_v12  ;;  %709 = vmatpush3.msra.mxu1 %v178_v38  ;;  %v144_v49 = vand.u32 4294901760, %v143_v43  ;;  %v213_v54 = vand.u32 4294901760, %v212_v51 }
  0x27   :  { %699 = vmatprep.subr.mxu0 %v857_v0  ;;  %710 = vmatprep.subr.mxu1 %v857_v0  ;;  %v219_v53 = vsub.f32 %v980_v45, %v218_v48 }
  0x28   :  { %700 = vmatpush3.msra.mxu0 %v920_v18  ;;  %711 = vmatpush3.msra.mxu1 %v185_v42 }
  0x29   :  { %701 = vmatprep.subr.mxu0 %v857_v0  ;;  %712 = vmatprep.subr.mxu1 %v857_v0  ;;  %v220_v55 = vand.u32 4294901760, %v219_v53 }
  0x2a   :  { %702 = vmatpush3.msra.mxu0 %v926_v20  ;;  %713 = vmatpush3.msra.mxu1 %v192_v46 }
  0x2b   :  { %714 = vmatprep.subr.mxu1 %v857_v0  ;;  %725 = vmatprep.subr.mxu0 %v857_v0 }
  0x2c   :  { %704 = vmatmul.mubr.f32.vlgmr.msra.gmra.mxu0 %v144_v49  ;;  %715 = vmatpush3.msra.mxu1 %v199_v50 }
  0x2d   :  { %726 = vmatpush3.msra.mxu0 %v915_v16  ;;  %716 = vmatprep.subr.mxu1 %v857_v0 }
  0x2e   :  { %727 = vmatprep.subr.mxu0 %v857_v0  ;;  %717 = vmatpush3.msra.mxu1 %v206_v52 }
  0x2f   :  { %728 = vmatpush3.msra.mxu0 %v918_v17  ;;  %718 = vmatprep.subr.mxu1 %v857_v0 }
  0x30   :  { %729 = vmatprep.subr.mxu0 %v857_v0  ;;  %719 = vmatpush3.msra.mxu1 %v213_v54 }
  0x31   :  { %730 = vmatpush3.msra.mxu0 %v923_v19  ;;  %720 = vmatprep.subr.mxu1 %v857_v0 }
  0x32   :  { %731 = vmatprep.subr.mxu0 %v857_v0  ;;  %721 = vmatpush3.msra.mxu1 %v220_v55 }
  0x33   :  { %732 = vmatpush3.msra.mxu0 %v929_v21  ;;  %723 = vmatmul.mubr.f32.vlgmr.msra.gmra.mxu1 %v939_v27 }
  0x34   :  { %733 = vmatprep.subr.mxu0 %v857_v0  ;;  %744 = vmatprep.subr.mxu1 %v857_v0 }
  0x35   :  { %734 = vmatpush3.msra.mxu0 %v933_v23  ;;  %745 = vmatpush3.msra.mxu1 %v901_v4 }
  0x36   :  { %735 = vmatprep.subr.mxu0 %v857_v0  ;;  %746 = vmatprep.subr.mxu1 %v857_v0 }
  0x37   :  { %736 = vmatpush3.msra.mxu0 %v945_v30  ;;  %747 = vmatpush3.msra.mxu1 %v903_v5 }
  0x38   :  { %737 = vmatprep.subr.mxu0 %v857_v0  ;;  %748 = vmatprep.subr.mxu1 %v857_v0 }
  0x39   :  { %738 = vmatpush3.msra.mxu0 %v948_v31  ;;  %749 = vmatpush3.msra.mxu1 %v905_v6 }
  0x3a   :  { %739 = vmatprep.subr.mxu0 %v857_v0  ;;  %750 = vmatprep.subr.mxu1 %v857_v0 }
  0x3b   :  { %740 = vmatpush3.msra.mxu0 %v980_v45  ;;  %741 = vmatprep.mubr.msk.f32.mxu0 %vm858_vm0, %v857_v0 }
  0x3c   :  { %751 = vmatpush3.msra.mxu1 %v907_v10  ;;  %742 = vmatmul.mubr.f32.vlgmr.msra.gmra.mxu0 %v961_v35 }
  0x3d   :  { %752 = vmatprep.subr.mxu1 %v857_v0  ;;  %763 = vmatprep.subr.mxu0 %v857_v0 }
  0x3e   :  { %753 = vmatpush3.msra.mxu1 %v909_v11  ;;  %764 = vmatpush3.msra.mxu0 %v169_v24 }
  0x3f   :  { %754 = vmatprep.subr.mxu1 %v857_v0  ;;  %765 = vmatprep.subr.mxu0 %v857_v0 }
  0x40   :  { %755 = vmatpush3.msra.mxu1 %v911_v12  ;;  %766 = vmatpush3.msra.mxu0 %v176_v25 }
  0x41   :  { %756 = vmatprep.subr.mxu1 %v857_v0  ;;  %767 = vmatprep.subr.mxu0 %v857_v0 }
  0x42   :  { %757 = vmatpush3.msra.mxu1 %v920_v18  ;;  %768 = vmatpush3.msra.mxu0 %v183_v26 }
  0x43   :  { %758 = vmatprep.subr.mxu1 %v857_v0  ;;  %769 = vmatprep.subr.mxu0 %v857_v0 }
  0x44   :  { %759 = vmatpush3.msra.mxu1 %v926_v20  ;;  %760 = vmatprep.mubr.msk.f32.mxu1 %vm858_vm0, %v857_v0 }
  0x45   :  { %770 = vmatpush3.msra.mxu0 %v190_v28  ;;  %761 = vmatmul.mubr.f32.vlgmr.msra.gmra.mxu1 %v142_v39 }
  0x46   :  { %771 = vmatprep.subr.mxu0 %v857_v0  ;;  %782 = vmatprep.subr.mxu1 %v857_v0 }
  0x47   :  { %772 = vmatpush3.msra.mxu0 %v197_v29  ;;  %783 = vmatpush3.msra.mxu1 %v901_v4 }
  0x48   :  { %773 = vmatprep.subr.mxu0 %v857_v0  ;;  %784 = vmatprep.subr.mxu1 %v857_v0 }
  0x49   :  { %774 = vmatpush3.msra.mxu0 %v204_v40  ;;  %785 = vmatpush3.msra.mxu1 %v903_v5 }
  0x4a   :  { %775 = vmatprep.subr.mxu0 %v857_v0  ;;  %786 = vmatprep.subr.mxu1 %v857_v0 }
  0x4b   :  { %776 = vmatpush3.msra.mxu0 %v211_v44  ;;  %787 = vmatpush3.msra.mxu1 %v905_v6 }
  0x4c   :  { %777 = vmatprep.subr.mxu0 %v857_v0  ;;  %788 = vmatprep.subr.mxu1 %v857_v0 }
  0x4d   :  { %778 = vmatpush3.msra.mxu0 %v218_v48  ;;  %779 = vmatprep.mubr.msk.f32.mxu0 %vm858_vm0, %v857_v0 }
  0x4e   :  { %789 = vmatpush3.msra.mxu1 %v907_v10  ;;  %780 = vmatmul.mubr.f32.vlgmr.msra.gmra.mxu0 %v939_v27 }
  0x4f   :  { %790 = vmatprep.subr.mxu1 %v857_v0  ;;  %798 = vmatprep.mubr.msk.f32.mxu1 %vm858_vm0, %v857_v0 }
  0x50   :  { %791 = vmatpush3.msra.mxu1 %v909_v11 }
  0x51   :  { %792 = vmatprep.subr.mxu1 %v857_v0 }
  0x52   :  { %793 = vmatpush3.msra.mxu1 %v911_v12  ;;  %v632_v12 = vld [vmem:[%s1106_s3] ss:$0 sm:$0xff] }
  0x53   :  { %794 = vmatprep.subr.mxu1 %v857_v0 }
  0x54   :  { %795 = vmatpush3.msra.mxu1 %v920_v18 }
  0x55   :  { %796 = vmatprep.subr.mxu1 %v857_v0 }
  0x56   :  { %797 = vmatpush3.msra.mxu1 %v926_v20 }
  0x57   :  { %799 = vmatmul.mubr.f32.vlgmr.msra.gmra.mxu1 %v939_v27 }
  0xec   :  { %v146_v56 = vpop.f32.mrf.mxu0 }
  0xed   :  { %v147_v2 = vadd.f32 %v631_v1, %v146_v56 }
  0xee   :  { %v705_v57 = vpop.f32.mrf.mxu0 }
  0xf3   :  { %v257_v58 = vpop.f32.mrf.mxu1 }
  0xf4   :  { %v258_v4 = vadd.f32 %v257_v58, %v147_v2 }
  0xf5   :  { %v724_v59 = vpop.f32.mrf.mxu1 }
  0xfc   :  { %v345_v60 = vpop.f32.mrf.mxu0 }
  0xfd   :  { %v346_v5 = vadd.f32 %v345_v60, %v258_v4 }
  0xfe   :  { %v743_v61 = vpop.f32.mrf.mxu0 }
 0x105   :  { %v426_v62 = vpop.f32.mrf.mxu1 }
 0x106   :  { %v427_v6 = vadd.f32 %v426_v62, %v346_v5 }
 0x107   :  { %v762_v63 = vpop.f32.mrf.mxu1 }
 0x10e   :  { %v521_v3 = vpop.f32.mrf.mxu0 }
 0x10f   :  { %v522_v7 = vadd.f32 %v521_v3, %v427_v6 }
 0x110   :  { %v781_v0 = vpop.f32.mrf.mxu0 }
 0x117   :  { %v600_v8 = vpop.f32.mrf.mxu1 }
 0x118   :  { %v601_v9 = vadd.f32 %v600_v8, %v522_v7 }
 0x119   :  { %v800_v10 = vpop.f32.mrf.mxu1 }
 0x11a   :  { %v604_v11 = vmul.f32 0.01, %v601_v9 }
 0x11c   :  { %v605_v13 = vmax.f32 %v601_v9, %v604_v11 }
 0x11e   :  { %v613_v14 = vmul.f32 %v632_v12, %v605_v13 }
 0x120   :  { %614 = vadd.xlane.f32.xlu0 %v613_v14 }
 0x1a9   :  { %v615_v16 = vpop.xlane.xlu0 %614 }
 0x1aa   :  { %v618_v17 = vadd.f32 %v617_v15, %v615_v16 }
 0x1ac   :  { %v619_v18 = vmul.f32 0.5, %v618_v17 }
 0x1ae   :  { %807 = vtanh.f32 %v619_v18 }
 0x1bb   :  { %v808_v19 = vpop.eup %807 }
 0x1bc   :  { %v621_v20 = vadd.f32 1.0, %v808_v19 }
 0x1be   :  { %v622_v21 = vmul.f32 0.5, %v621_v20 }
 0x1c0   :  { %624 = vst.msk [vmem:[%s1108_s5] sm:$0xff] %vm623_vm2, %v622_v21 }
 0x1c1   :  { %629 = vsyncpa [#allocation4], 1 }
 0x1c2   :  { %630 = vsyncpa [#allocation6], 1 }

</bundles_post_ra>
